<compile_context>
chip_gen: v7x
topology: tpu7x:2x2x1
jax: 0.10.0
libtpu: 0.0.40
codegen_flags: <defaults>
</compile_context>

<pallas_src>
import numpy as np
import jax
import jax.numpy as jnp
from jax.experimental import pallas as pl
from jax.experimental.pallas import tpu as pltpu


# ----------------------------- Pallas kernel ------------------------------- #
def device_encoder_kernel(x_ref, p_ref, w_ref, out_ref):
    """Spreader matmul -> compare/select -> fused matmul, lane-dense store.

    x_ref   : [TB, 16]    f32  (9 op indices, 5 device feats, 0-pad, 1.0)
    p_ref   : [16, 64]    f32  spreader: lane 6p+j gets (op_p + 6p), lane 54+d
                               gets dev_d, lane 59 gets the constant 1.0
    w_ref   : [64, Npad]  f32  block-diagonal fused weight, bias in row 59
    out_ref : [TB, Npad]
    """
    spread = jnp.dot(x_ref[...], p_ref[...],
                     preferred_element_type=jnp.float32,
                     precision=jax.lax.Precision.HIGHEST)          # [TB, 64]

    lane = jax.lax.broadcasted_iota(jnp.int32, spread.shape, 1)
    # Lanes [0,54): spread == (6p + op_p); hot lane is exactly the lane index,
    # so the one-hot is a single compare against the lane iota.
    one_hot = (spread == lane.astype(jnp.float32)).astype(jnp.float32)
    # Lanes [54,59): device features pass through; lane 59 = 1.0 (selects the
    # bias row of w); lanes [60,64) stay zero.
    feat = jnp.where(lane < 54, one_hot, spread)                   # [TB, 64]

    out_ref[...] = jnp.dot(feat, w_ref[...],
                           preferred_element_type=jnp.float32,
                           precision=jax.lax.Precision.HIGHEST
                           ).astype(out_ref.dtype)


# ------------------------------- helpers ------------------------------------ #
def _round_up(n, m):
    return ((n + m - 1) // m) * m


def _choose_tb(batch, tb):
    """Batch tile: multiple of 8 sublanes, capped so the grid has >= 2 steps
    (so v7x can shard the parallel batch axis across its two TensorCores)."""
    if batch <= 8:
        return batch                                    # one full tile
    cap = max(8, (pl.cdiv(batch, 2) // 8) * 8)          # at most ~half the batch
    tb = min(tb, cap, batch)
    return max(8, (tb // 8) * 8)


# ------------------------------- wrapper ------------------------------------ #
def device_encoder_forward(op_idx, device_info, w_mlp, b_mlp, w_tr, b_tr, *,
                           tb=1024, out_dtype=jnp.float32):
    """op_idx: [B, 9] int (classes 0..5), device_info: [B, 5] float.

    Weights are stored [in_features, out_features] (transpose of PyTorch).
    Returns [B, 2*dim] = concat(seq_embeds, device_name_embeds).
    Pass out_dtype=jnp.bfloat16 to halve store bandwidth (biggest win on v5e)
    if downstream consumers tolerate it.
    """
    B = op_idx.shape[0]
    dim = w_mlp.shape[1]
    n_out = 2 * dim
    n_pad = _round_up(n_out, 128)   # lane-dense (unmasked) output stores
    k_in = 64                       # 54 one-hot + 5 dev + bias + pad -> 64
    k_x = 16                        # 9 op + 5 dev + pad + bias-constant

    # Packed per-row input: [op_idx (f32), device_info, 0, 1.0]  -> one DMA.
    x = jnp.concatenate(
        [op_idx.astype(jnp.float32),
         device_info.astype(jnp.float32),
         jnp.zeros((B, 1), jnp.float32),
         jnp.ones((B, 1), jnp.float32)], axis=-1)

    # Spreader P [16, 64]:
    #   column p (op index)    -> lanes 6p..6p+5      (value op_p)
    #   constant-1 column (15) -> lanes 6p..6p+5 add 6p, lane 59 gets 1.0
    #   column 9+d (device)    -> lane 54+d
    # so spread[:, 6p+j] = op_p + 6p  and the hot lane equals the lane index.
    p_np = np.zeros((k_x, k_in), np.float32)
    for p in range(9):
        p_np[p, 6 * p:6 * p + 6] = 1.0
        p_np[15, 6 * p:6 * p + 6] = 6.0 * p
    for d in range(5):
        p_np[9 + d, 54 + d] = 1.0
    p_np[15, 59] = 1.0
    p_mat = jnp.asarray(p_np)

    # Block-diagonal fused weight with the bias folded into row 59.
    w_fused = jnp.zeros((k_in, n_pad), jnp.float32)
    w_fused = w_fused.at[:54, :dim].set(w_mlp.astype(jnp.float32))
    w_fused = w_fused.at[54:59, dim:n_out].set(w_tr.astype(jnp.float32))
    w_fused = w_fused.at[59, :n_out].set(
        jnp.concatenate([b_mlp, b_tr]).astype(jnp.float32))

    tb = _choose_tb(B, tb)
    grid = (pl.cdiv(B, tb),)

    # VMEM hint from lane-/sublane-padded block sizes, x2 double buffering.
    out_bytes = np.dtype(out_dtype).itemsize
    tb_pad = _round_up(tb, 8)
    per_buf = (4 * tb_pad * 128            # packed input block (16 -> 128 lanes)
               + 4 * 16 * 128              # spreader block     (64 -> 128 lanes)
               + 4 * k_in * n_pad          # fused weight block
               + out_bytes * tb_pad * n_pad)   # output block
    vmem_limit = int(min(100 << 20, max(2 * per_buf + (2 << 20), 8 << 20)))

    flops = 2 * B * (k_x * k_in + k_in * n_pad)
    bytes_accessed = (4 * (B * k_x + k_x * k_in + k_in * n_pad)
                      + out_bytes * B * n_pad)

    out = pl.pallas_call(
        device_encoder_kernel,
        out_shape=jax.ShapeDtypeStruct((B, n_pad), out_dtype),
        grid=grid,
        in_specs=[
            pl.BlockSpec((tb, k_x), lambda i: (i, 0)),        # packed features
            pl.BlockSpec((k_x, k_in), lambda i: (0, 0)),      # resident spreader
            pl.BlockSpec((k_in, n_pad), lambda i: (0, 0)),    # resident weight
        ],
        out_specs=pl.BlockSpec((tb, n_pad), lambda i: (i, 0)),
        compiler_params=pltpu.CompilerParams(
            dimension_semantics=("parallel",),
            vmem_limit_bytes=vmem_limit,
        ),
        cost_estimate=pl.CostEstimate(
            flops=flops, transcendentals=0, bytes_accessed=bytes_accessed),
    )(x, p_mat, w_fused)

    return out if n_pad == n_out else out[:, :n_out]


# -------------------------- deterministic params ---------------------------- #
def init_params(key, dim, in_mlp=6 * 9, in_transfer=5):
    """PyTorch nn.Linear-style uniform(-1/sqrt(fan_in), 1/sqrt(fan_in)) init."""
    k1, k2, k3, k4 = jax.random.split(key, 4)
    lim1 = 1.0 / jnp.sqrt(in_mlp)
    lim2 = 1.0 / jnp.sqrt(in_transfer)
    w_mlp = jax.random.uniform(k1, (in_mlp, dim), jnp.float32, -lim1, lim1)
    b_mlp = jax.random.uniform(k2, (dim,), jnp.float32, -lim1, lim1)
    w_tr = jax.random.uniform(k3, (in_transfer, dim), jnp.float32, -lim2, lim2)
    b_tr = jax.random.uniform(k4, (dim,), jnp.float32, -lim2, lim2)
    return w_mlp, b_mlp, w_tr, b_tr


# ------------------------------- reference ---------------------------------- #
def device_encoder_reference(op_idx, device_info, w_mlp, b_mlp, w_tr, b_tr):
    B = op_idx.shape[0]
    one_hot = jax.nn.one_hot(op_idx, 6, dtype=jnp.float32).reshape(B, -1)
    seq = jnp.dot(one_hot, w_mlp,
                  precision=jax.lax.Precision.HIGHEST) + b_mlp
    dev = jnp.dot(device_info.astype(jnp.float32), w_tr,
                  precision=jax.lax.Precision.HIGHEST) + b_tr
    return jnp.concatenate([seq, dev], axis=-1)


if __name__ == "__main__":
    B = 24     # small batch; _choose_tb caps tb -> 3 grid steps (pipeline test)
    DIM = 64   # args.dimension -> output width 2*DIM = 128 (lane-dense stores)
    key = jax.random.PRNGKey(0)
    k_param, k_op, k_dev = jax.random.split(key, 3)

    w_mlp, b_mlp, w_tr, b_tr = init_params(k_param, DIM)

    # inputs: 9 op indices per example (classes 0..5), 5 cpu device features
    op_idx = jax.random.randint(k_op, (B, 9), 0, 6, dtype=jnp.int32)
    device_info = jax.random.normal(k_dev, (B, 5), dtype=jnp.float32)

    out = device_encoder_forward(op_idx, device_info,
                                 w_mlp, b_mlp, w_tr, b_tr)
    out = jax.block_until_ready(out)

    ref = device_encoder_reference(op_idx, device_info, w_mlp, b_mlp, w_tr, b_tr)
    assert out.shape == (B, 2 * DIM), out.shape
    assert jnp.allclose(out, ref, atol=1e-5, rtol=1e-5), "mismatch vs reference"

    print("KERNEL_OK")
</pallas_src>

<mosaic_0001>
module attributes {stable_mosaic.version = 11 : i64} {
  func.func @device_encoder_kernel(%arg0: i32, %arg1: memref<8x16xf32, #tpu.memory_space<vmem>>, %arg2: memref<16x64xf32, #tpu.memory_space<vmem>>, %arg3: memref<64x128xf32, #tpu.memory_space<vmem>>, %arg4: memref<8x128xf32, #tpu.memory_space<vmem>>) attributes {dimension_semantics = [#tpu.dimension_semantics<parallel>], iteration_bounds = array<i64: 3>, scalar_prefetch = 0 : i64, scratch_operands = 0 : i64, tpu.core_type = #tpu.core_type<tc>, window_params = [{transform_indices = @transform_0, window_bounds = array<i64: 8, 16>}, {pipeline_mode = #tpu.pipeline_mode<synchronous>, transform_indices = @transform_1, window_bounds = array<i64: 16, 64>}, {pipeline_mode = #tpu.pipeline_mode<synchronous>, transform_indices = @transform_2, window_bounds = array<i64: 64, 128>}, {transform_indices = @transform_3, window_bounds = array<i64: 8, 128>}]} {
    %c0 = arith.constant 0 : index
    %c0_0 = arith.constant 0 : index
    %0 = vector.load %arg1[%c0, %c0_0] : memref<8x16xf32, #tpu.memory_space<vmem>>, vector<8x16xf32>
    %c0_1 = arith.constant 0 : index
    %c0_2 = arith.constant 0 : index
    %1 = vector.load %arg2[%c0_1, %c0_2] : memref<16x64xf32, #tpu.memory_space<vmem>>, vector<16x64xf32>
    %cst = arith.constant dense<0.000000e+00> : vector<8x64xf32>
    %2 = tpu.matmul %0, %1, %cst {dimension_numbers = #tpu.dot_dimension_numbers<[1], [0], [0], [1], [0, 0, 1, 1], [], []>, precision = #tpu.contract_precision<fp32>} : vector<8x16xf32>, vector<16x64xf32>, vector<8x64xf32> -> vector<8x64xf32>
    %3 = tpu.iota {dimensions = array<i32: 1>} : vector<8x64xi32>
    %4 = arith.sitofp %3 : vector<8x64xi32> to vector<8x64xf32>
    %5 = arith.cmpf oeq, %2, %4 : vector<8x64xf32>
    %6 = arith.extui %5 : vector<8x64xi1> to vector<8x64xi32>
    %7 = arith.sitofp %6 : vector<8x64xi32> to vector<8x64xf32>
    %c54_i32 = arith.constant 54 : i32
    %8 = vector.broadcast %c54_i32 : i32 to vector<8x64xi32>
    %9 = arith.cmpi slt, %3, %8 : vector<8x64xi32>
    %10 = arith.select %9, %7, %2 : vector<8x64xi1>, vector<8x64xf32>
    %c0_3 = arith.constant 0 : index
    %c0_4 = arith.constant 0 : index
    %11 = vector.load %arg3[%c0_3, %c0_4] : memref<64x128xf32, #tpu.memory_space<vmem>>, vector<64x128xf32>
    %cst_5 = arith.constant dense<0.000000e+00> : vector<8x128xf32>
    %12 = tpu.matmul %10, %11, %cst_5 {dimension_numbers = #tpu.dot_dimension_numbers<[1], [0], [0], [1], [0, 0, 1, 1], [], []>, precision = #tpu.contract_precision<fp32>} : vector<8x64xf32>, vector<64x128xf32>, vector<8x128xf32> -> vector<8x128xf32>
    %c0_6 = arith.constant 0 : index
    %c0_7 = arith.constant 0 : index
    %13 = vector.load %arg4[%c0_6, %c0_7] : memref<8x128xf32, #tpu.memory_space<vmem>>, vector<8x128xf32>
    tpu.vector_store %arg4[%c0_6, %c0_7], %12 {strides = array<i32>} : memref<8x128xf32, #tpu.memory_space<vmem>>, vector<8x128xf32>,
    return
  }
  func.func @transform_0(%arg0: i32) -> (i32, i32) {
    %c0_i32 = arith.constant 0 : i32
    %c0_i32_0 = arith.constant 0 : i32
    return %arg0, %c0_i32 : i32, i32
  }
  func.func @transform_1(%arg0: i32) -> (i32, i32) {
    %c0_i32 = arith.constant 0 : i32
    %c0_i32_0 = arith.constant 0 : i32
    %c0_i32_1 = arith.constant 0 : i32
    return %c0_i32, %c0_i32_0 : i32, i32
  }
  func.func @transform_2(%arg0: i32) -> (i32, i32) {
    %c0_i32 = arith.constant 0 : i32
    %c0_i32_0 = arith.constant 0 : i32
    %c0_i32_1 = arith.constant 0 : i32
    return %c0_i32, %c0_i32_0 : i32, i32
  }
  func.func @transform_3(%arg0: i32) -> (i32, i32) {
    %c0_i32 = arith.constant 0 : i32
    %c0_i32_0 = arith.constant 0 : i32
    return %arg0, %c0_i32 : i32, i32
  }
}

</mosaic_0001>

<bundles_post_ra>
// kernel: tpu_custom_call.1
= control target key start
LH: loop header
LB: loop body
LE: loop exit
PB: predicated region body
PF: predicated region fallthrough
CT: control target
= control target key end

     0   :  { %8 = vsyncpa [#allocation3], 0  ;;  %s2070_s0 = inlined_call_operand.vmem [shape: f32[24,16], index: 0, kind: input, shape index: {}]   ;;  %s2071_s1 = inlined_call_operand.vmem [shape: f32[16,64], index: 1, kind: input, shape index: {}]   ;;  %s2072_s2 = inlined_call_operand.hbm [shape: f32[64,128], index: 2, kind: input, shape index: {}]   ;;  %s2073_s3 = inlined_call_operand.hbm [shape: f32[24,128], index: 3, kind: output, shape index: {}]  }
   0x1   :  { %9 = vsyncpa [#allocation4], 0 }
   0x2   :  { %11 = vsyncpa [#allocation4 + $0x1], 0  ;;  %s1818_s12 = smov 0   ;;  %s1820_s13 = smov 0  }
   0x3   :  { %s1822_s14 = smov 0   ;;  %s1824_s15 = smov 0  }
   0x4 LB: > { %s1839_s16 = sadd.s32 4294967295, %s1789_s15   ;;  %s1290_s17 = sadd.s32 4294967294, %s1789_s15   ;;  %s1789_s15 = sphi %s1824_s15, %s2089_s15   ;;  %s1785_s14 = sphi %s1822_s14, %s2088_s14   ;;  %s1781_s13 = sphi %s1820_s13, %s2087_s13   ;;  %s1777_s12 = sphi %s1818_s12, %s2086_s12  }
   0x5   : > { %s1843_s18 = sadd.s32 1, %s1789_s15   ;;  %s92_s19 = sadd.s32 1, %s1785_s14 }
   0x6   : > { %s89_s20 = ssub.s32 %s1789_s15, %s1843_s18  ;;  %p102_p0 = scmp.ne.s32.totalorder %s1785_s14, %s1781_s13 }
   0x7   : > { %p90_p1 = scmp.eq.s32.totalorder %s89_s20, 0  ;;  %p103_p2 = scmp.eq.s32.totalorder %s1839_s16, 2 }
   0x8   : > { %p108_p3 = scmp.ne.s32.totalorder %s1781_s13, %s1777_s12  ;;  %p109_p4 = scmp.eq.s32.totalorder %s1290_s17, 2 }
   0x9   : > { %s1854_s21 = scalar_select %p90_p1, %s1785_s14, %s92_s19  }
   0xa   : > { %p1856_p5 = por %p103_p2, %p102_p0  ;;  %p1860_p6 = por %p109_p4, %p108_p3 }
   0xb   : > { %p1291_p7 = scmp.ge.s32.totalorder %s1789_s15, 1  ;;  %p116_p8 = scmp.lt.s32.totalorder %s1789_s15, 4 }
   0xc   : > { %s2077_s22 = scalar_select %p1856_p5, 1, 0 }
   0xd   : > { %s2078_s23 = scalar_select %p1860_p6, 1, 0 }
   0xe   : > { %p2074_p9 = scmp.eq.s32.totalorder %s1839_s16, 0  ;;  %p1867_p10 = pnand %p1291_p7, %p116_p8 }
   0xf   : > { %s1791_s25 = smov [#allocation2]   ;;  %s1695_s30 = scalar_lea.hbm %s2072_s2, 1024 }
  0x10   : > { %s2079_s24 = scalar_select %p1867_p10, 1, 0 }
  0x11   : > { %s131_s26 = sshll.u32 %s1791_s25, 4  ;;  %p1646_p11 = pneg %p1867_p10  ;;  %s132_s26 = int_to_ptr.vmem [resolvable:$true] %s131_s26 }
  0x12   : > { %p1696_p13 = scmp.ne.s32.totalorder %s2072_s2, %s1695_s30  ;;  %p1702_p3 = scmp.lt.u32.totalorder %s1695_s30, %s2072_s2 }
  0x13   : > { %p1875_p12 = pnand %p2074_p9, %p1646_p11 }
  0x15   : > { %p1697_p0 = pneg %p1875_p12 }
  0x17   : > { %p1698_p1 = pnand %p1697_p0, %p1696_p13 }
  0x19   : > { %p1699_p2 = pneg %p1698_p1 }
  0x1b   : > { %p1704_p4 = pnand %p1702_p3, %p1699_p2 }
  0x1d   : > { %1707 = shalt.err (!%p1704_p4)
}
  0x1e   : > { %s1708_s8 = scalar_lea.vmem %s132_s26, 1024  ;;  %p1716_p9 = scmp.lt.s32.totalorder %s132_s26, %s132_s26 }
  0x1f   : > { %p1709_p7 = scmp.ne.s32.totalorder %s132_s26, %s1708_s8  ;;  %p1717_p6 = scmp.lt.s32.totalorder %s1708_s8, %s1708_s8 }
  0x21   : > { %p1711_p8 = pnand %p1709_p7, %p1697_p0  ;;  %p1718_p5 = por %p1717_p6, %p1716_p9 }
  0x23   : > { %p1712_p11 = pneg %p1711_p8 }
  0x25   : > { %p1719_p10 = pnand %p1718_p5, %p1712_p11 }
  0x27   : > { %1722 = shalt.err (!%p1719_p10)
}
  0x28   : > { %s1792_s9 = smov 128   ;;  %s1793_s10 = smov 8  }
  0x29   : > { %1649 = dma.hbm_to_vmem [thread:$0]  (!%p1875_p12), %s2072_s2, 1024, %s132_s26, [#allocation3], %s1792_s9, %s1792_s9, %s1793_s10  }
  0x2a   : > { %p2081_p13 = scmp.ne.s32.totalorder %s2079_s24, 0 }
  0x2b   : > { %p2082_p1 = scmp.eq.s32.totalorder (!%p2081_p13), %s1839_s16, 0 }
  0x2c   : > { %154 = sbr.rel (%p2081_p13) target bundleno = 606 (0x25e), region = 32 }
  0x33   : > { %1768 = dma.done.wait (%p2082_p1), [#allocation3], 1024   ;;  %p2083_p0 = pmov %p2082_p1 }
  0x34   : > { %p177_p5 = scmp.lt.s32.totalorder %s1839_s16, 2  ;;  %v1794_v0 = vmov 0.0|0.0   ;;  %vm1795_vm0 = vmmov 0   ;;  %v1796_v1 = vmov 0.0   ;;  %vm184_vm1 = vcmask 130048   ;;  %v182_v2 = vld [vmem:[%s2071_s1] sm:$0xff] }
  0x35   : > { %1770 = vsyncadd (%p2083_p0), [#allocation3], 4294966272  ;;  %1531 = vmatprep.subr.bf16.mxu0 %v1794_v0  ;;  %1379 = vmatprep.mubr.msk.f32.mxu0 %vm1795_vm0, %v1796_v1  ;;  %v183_v3 = vld [vmem:[%s2071_s1 + $0x8] sm:$0xff]  ;;  %v189_v5 = vand.u32 4294901760, %v182_v2  ;;  %v655_v8 = vld [vmem:[#allocation2] sm:$0xff]  ;;  %vm663_vm4 = vcmask 523264  }
  0x36   : > { %s178_s19 = scalar_select %p177_p5, %s1839_s16, 2  ;;  %1573 = vmatprep.subr.bf16.mxu1 %v1794_v0  ;;  %1471 = vmatprep.mubr.msk.f32.mxu1 %vm1795_vm0, %v1796_v1  ;;  %v192_v6 = vand.u32 4294901760, %v183_v3  ;;  %v656_v9 = vld [vmem:[#allocation2 + $0x8] sm:$0xff]  ;;  %v1918_v10 = vld [vmem:[#allocation2 + $0x10] sm:$0xff]  ;;  %v668_v12 = vand.u32 4294901760, %v655_v8  ;;  %v1920_v14 = vld [vmem:[#allocation2 + $0x18] sm:$0xff] }
  0x37   : > { %v671_v13 = vand.u32 4294901760, %v656_v9  ;;  %v674_v15 = vand.u32 4294901760, %v1918_v10  ;;  %v267_v17 = vsub.f32 %v182_v2, %v189_v5  ;;  %v677_v19 = vand.u32 4294901760, %v1920_v14  ;;  %v659_v40 = vld [vmem:[#allocation2 + $0x20] sm:$0xff]  ;;  %v660_v41 = vld [vmem:[#allocation2 + $0x28] sm:$0xff]  ;;  %v661_v46 = vld [vmem:[#allocation2 + $0x30] sm:$0xff] }
  0x38   : > { %s1297_s20 = sshll.u32 %s178_s19, 3  ;;  %v1532_v16 = vpack.c.bf16 %v192_v6, %v189_v5  ;;  %v274_v18 = vsub.f32 %v183_v3, %v192_v6  ;;  %v1924_v21 = vsub.f32 %v655_v8, %v668_v12  ;;  %v680_v42 = vand.u32 4294901760, %v659_v40  ;;  %v662_v47 = vld [vmem:[#allocation2 + $0x38] sm:$0xff]  ;;  %s174_s4 = sand.u32 1, %s1781_s13  }
  0x39   : > { %s180_s26 = scalar_lea.vmem %s2070_s0, %s1297_s20  ;;  %v1926_v22 = vsub.f32 %v656_v9, %v671_v13  ;;  %v1931_v23 = vsub.f32 %v1918_v10, %v674_v15  ;;  %v268_v24 = vand.u32 4294901760, %v267_v17  ;;  %v1936_v26 = vsub.f32 %v1920_v14, %v677_v19  ;;  %s1296_s5 = sshll.u32 %s174_s4, 3 }
  0x3a   : > { %v181_v4 = vld [vmem:[%s180_s26] sm:$0xff]  ;;  %1533 = vmatpush3.bf16.msra.mxu0 %v1532_v16  ;;  %v275_v25 = vand.u32 4294901760, %v274_v18  ;;  %v1538_v37 = vpack.c.bf16 %v274_v18, %v267_v17  ;;  %v1960_v39 = vpack.c.bf16 %v671_v13, %v668_v12  ;;  %v683_v43 = vand.u32 4294901760, %v660_v41  ;;  %s1300_s6 = sshll.u32 %s1839_s16, 7  ;;  %s176_s7 = scalar_lea.vmem [#allocation5], %s1296_s5 }
  0x3b   : > { %v186_v7 = vsel %vm184_vm1, %v181_v4, 0  ;;  %1534 = vmatprep.subr.bf16.mxu0 %v1794_v0  ;;  %v1574_v28 = vpack.c.bf16 %v1926_v22, %v1924_v21  ;;  %v269_v29 = vsub.f32 %v267_v17, %v268_v24  ;;  %v1577_v32 = vpack.c.bf16 %v1936_v26, %v1931_v23  ;;  %s1219_s8 = sshll.u32 %s176_s7, 4  ;;  %s2028_s11 = scalar_lea.hbm %s2073_s3, %s1300_s6  ;;  %s2030_s8 = int_to_ptr.vmem [resolvable:$true] %s1219_s8 }
  0x3c   : > { %v255_v11 = vand.u32 4294901760, %v186_v7  ;;  %v276_v30 = vsub.f32 %v274_v18, %v275_v25  ;;  %v1544_v38 = vpack.c.bf16 %v275_v25, %v268_v24  ;;  %v780_v44 = vsub.f32 %v659_v40, %v680_v42  ;;  %s1206_s17 = scalar_lea.sflag [#allocation4], %s174_s4  ;;  %s1723_s19 = scalar_lea.vmem %s2030_s8, 128 }
  0x3d   : > { %1575 = vmatpush3.bf16.msra.mxu1 %v1574_v28  ;;  %v270_v33 = vand.u32 4294901760, %v269_v29  ;;  %v787_v45 = vsub.f32 %v660_v41, %v683_v43  ;;  %v686_v49 = vand.u32 4294901760, %v661_v46  ;;  %v689_v50 = vand.u32 4294901760, %v662_v47  ;;  %p1724_p6 = scmp.ne.s32.totalorder %s2030_s8, %s1723_s19  ;;  %p2084_p9 = scmp.ne.s32.totalorder %s2077_s22, 0 }
  0x3e   : > { %v256_v20 = vsub.f32 %v186_v7, %v255_v11  ;;  %v277_v34 = vand.u32 4294901760, %v276_v30  ;;  %1576 = vmatprep.subr.bf16.mxu1 %v1794_v0  ;;  %v1970_v51 = vpack.c.bf16 %v677_v19, %v674_v15  ;;  %v1975_v55 = vpack.c.bf16 %v683_v43, %v680_v42  ;;  %s1797_s16 = smov [#allocation5]  }
  0x3f   : > { %v1580_v48 = vpack.c.bf16 %v787_v45, %v780_v44  ;;  %v794_v52 = vsub.f32 %v661_v46, %v686_v49  ;;  %v801_v53 = vsub.f32 %v662_v47, %v689_v50  ;;  %v1980_v56 = vpack.c.bf16 %v689_v50, %v686_v49  ;;  %p1725_p10 = pnand %p1724_p6, %p2084_p9  ;;  %s1727_s20 = sshll.u32 %s1797_s16, 4  ;;  %s1728_s20 = int_to_ptr.vmem [resolvable:$false] %s1727_s20 }
  0x40   : > { %v257_v27 = vand.u32 4294901760, %v256_v20  ;;  %v1535_v36 = vpack.c.bf16 %v277_v34, %v270_v33  ;;  %v781_v57 = vand.u32 4294901760, %v780_v44  ;;  %v788_v58 = vand.u32 4294901760, %v787_v45  ;;  %s1729_s24 = scalar_lea.vmem %s1728_s20, 256  ;;  %p1730_p2 = scmp.lt.s32.totalorder %s2030_s8, %s1728_s20 }
  0x41   : > { %1578 = vmatpush3.bf16.msra.mxu1 %v1577_v32  ;;  %v1583_v54 = vpack.c.bf16 %v801_v53, %v794_v52  ;;  %v795_v63 = vand.u32 4294901760, %v794_v52  ;;  %v802_v2 = vand.u32 4294901760, %v801_v53  ;;  %v753_v14 = vand.u32 4294901760, %v1924_v21  ;;  %p1726_p12 = pneg %p1725_p10  ;;  %p1731_p3 = scmp.lt.s32.totalorder %s1729_s24, %s1723_s19 }
  0x42   : > { %v258_v31 = vsub.f32 %v256_v20, %v257_v27  ;;  %1579 = vmatprep.subr.bf16.mxu1 %v1794_v0  ;;  %v782_v59 = vsub.f32 %v780_v44, %v781_v57  ;;  %v789_v60 = vsub.f32 %v787_v45, %v788_v58  ;;  %v1604_v9 = vpack.c.bf16 %v788_v58, %v781_v57 }
  0x43   : > { %v796_v4 = vsub.f32 %v794_v52, %v795_v63  ;;  %v803_v5 = vsub.f32 %v801_v53, %v802_v2  ;;  %v1607_v10 = vpack.c.bf16 %v802_v2, %v795_v63  ;;  %v760_v15 = vand.u32 4294901760, %v1926_v22  ;;  %p1732_p4 = por %p1731_p3, %p1730_p2 }
  0x44   : > { %v259_v35 = vand.u32 4294901760, %v258_v31  ;;  %v783_v61 = vand.u32 4294901760, %v782_v59  ;;  %v790_v62 = vand.u32 4294901760, %v789_v60  ;;  %v774_v28 = vand.u32 4294901760, %v1936_v26 }
  0x45   : > { %1581 = vmatpush3.bf16.msra.mxu1 %v1580_v48  ;;  %v797_v6 = vand.u32 4294901760, %v796_v4  ;;  %v804_v7 = vand.u32 4294901760, %v803_v5  ;;  %v761_v25 = vsub.f32 %v1926_v22, %v760_v15  ;;  %p1733_p7 = pnand %p1732_p4, %p1726_p12 }
  0x46   : > { %1380 = vmatmul.mubr.f32.vlgmr.msra.gmra.mrb[0].mxu0 %v259_v35  ;;  %1582 = vmatprep.subr.bf16.mxu1 %v1794_v0  ;;  %v1568_v3 = vpack.c.bf16 %v790_v62, %v783_v61  ;;  %v775_v34 = vsub.f32 %v1936_v26, %v774_v28  ;;  %v1598_v26 = vpack.c.bf16 %v760_v15, %v753_v14 }
  0x47   : > { %1536 = vmatpush3.bf16.msra.mxu0 %v1535_v36  ;;  %1386 = vmatprep.mubr.msk.f32.mxu0 %vm1795_vm0, %v1796_v1  ;;  %v1571_v8 = vpack.c.bf16 %v804_v7, %v797_v6  ;;  %v762_v32 = vand.u32 4294901760, %v761_v25 }
  0x48   : > { %1537 = vmatprep.subr.bf16.mxu0 %v1794_v0 }
  0x49   : > { %1584 = vmatpush3.bf16.msra.mxu1 %v1583_v54 }
  0x4a   : > { %1585 = vmatprep.subr.bf16.mxu1 %v1794_v0 }
  0x4e   : > { %1387 = vmatmul.mubr.f32.vlgmr.msra.gmra.mrb[0].mxu0 %v255_v11 }
  0x4f   : > { %1539 = vmatpush3.bf16.msra.mxu0 %v1538_v37  ;;  %1393 = vmatprep.mubr.msk.f32.mxu0 %vm1795_vm0, %v1796_v1  ;;  %v776_v37 = vand.u32 4294901760, %v775_v34 }
  0x50   : > { %1540 = vmatprep.subr.bf16.mxu0 %v1794_v0 }
  0x56   : > { %1394 = vmatmul.mubr.f32.vlgmr.msra.gmra.mrb[0].mxu0 %v256_v20  ;;  %v754_v20 = vsub.f32 %v1924_v21, %v753_v14 }
  0x57   : > { %1542 = vmatpush3.bf16.msra.mxu0 %v1532_v16  ;;  %1400 = vmatprep.mubr.msk.f32.mxu0 %vm1795_vm0, %v1796_v1 }
  0x58   : > { %1543 = vmatprep.subr.bf16.mxu0 %v1794_v0  ;;  %v755_v31 = vand.u32 4294901760, %v754_v20 }
  0x5a   : > { %v1562_v22 = vpack.c.bf16 %v762_v32, %v755_v31 }
  0x5e   : > { %1401 = vmatmul.mubr.f32.vlgmr.msra.gmra.mrb[0].mxu0 %v257_v27  ;;  %v767_v27 = vand.u32 4294901760, %v1931_v23 }
  0x5f   : > { %1545 = vmatpush3.bf16.msra.mxu0 %v1544_v38  ;;  %1407 = vmatprep.mubr.msk.f32.mxu0 %vm1795_vm0, %v1796_v1 }
  0x60   : > { %1546 = vmatprep.subr.bf16.mxu0 %v1794_v0  ;;  %v768_v33 = vsub.f32 %v1931_v23, %v767_v27  ;;  %v1601_v40 = vpack.c.bf16 %v774_v28, %v767_v27 }
  0x62   : > { %v769_v36 = vand.u32 4294901760, %v768_v33 }
  0x64   : > { %v1565_v23 = vpack.c.bf16 %v776_v37, %v769_v36 }
  0x66   : > { %1408 = vmatmul.mubr.f32.vlgmr.msra.gmra.mrb[0].mxu0 %v255_v11 }
  0x67   : > { %1548 = vmatpush3.bf16.msra.mxu0 %v1532_v16  ;;  %1414 = vmatprep.mubr.msk.f32.mxu0 %vm1795_vm0, %v1796_v1 }
  0x68   : > { %1549 = vmatprep.subr.bf16.mxu0 %v1794_v0 }
  0x6e   : > { %1415 = vmatmul.mubr.f32.vlgmr.msra.gmra.mrb[0].mxu0 %v255_v11  ;;  %v647_v11 = vlaneseq }
  0x6f   : > { %1551 = vmatpush3.bf16.msra.mxu0 %v1960_v39  ;;  %1433 = vmatprep.mubr.msk.f32.mxu0 %vm1795_vm0, %v1796_v1 }
  0x70   : > { %1552 = vmatprep.subr.bf16.mxu0 %v1794_v0  ;;  %v648_v12 = vand.u32 127, %v647_v11 }
  0x72   : > { %v649_v13 = vcvt.s32.f32 %v648_v12  ;;  %vm653_vm2 = vcmp.lt.s32.totalorder %v648_v12, 54 }
  0x73   : > { %1554 = vmatpush3.bf16.msra.mxu0 %v1970_v51 }
  0x74   : > { %1555 = vmatprep.subr.bf16.mxu0 %v1794_v0 }
  0x77   : > { %1557 = vmatpush3.bf16.msra.mxu0 %v1975_v55 }
  0x78   : > { %1558 = vmatprep.subr.bf16.mxu0 %v1794_v0 }
  0x7b   : > { %1560 = vmatpush3.bf16.msra.mxu0 %v1980_v56 }
  0x7c   : > { %1561 = vmatprep.subr.bf16.mxu0 %v1794_v0 }
 0x141   : > { %v643_v16 = vpop.f32.mrb[0].mxu0 }
 0x142   : > { %vm650_vm3 = vcmp.eq.f32.partialorder %v643_v16, %v649_v13  ;;  %v1416_v17 = vpop.f32.mrb[1].mxu0 }
 0x143   : > { %v1298_v18 = vsel %vm650_vm3, 1.0, %v1796_v1 }
 0x144   : > { %v654_v19 = vsel %vm653_vm2, %v1298_v18, %v643_v16 }
 0x145   : > { %v665_v24 = vsel %vm663_vm4, %v654_v19, 0 }
 0x146   : > { %v740_v29 = vand.u32 4294901760, %v665_v24 }
 0x148   : > { %v741_v30 = vsub.f32 %v665_v24, %v740_v29 }
 0x14a   : > { %v742_v35 = vand.u32 4294901760, %v741_v30  ;;  %1472 = vmatmul.mubr.f32.vlgmr.msra.gmra.mrb[0].mxu1 %v741_v30 }
 0x14b   : > { %1587 = vmatpush3.bf16.msra.mxu1 %v1960_v39  ;;  %1490 = vmatprep.mubr.msk.f32.mxu1 %vm1795_vm0, %v1796_v1 }
 0x14c   : > { %1588 = vmatprep.subr.bf16.mxu1 %v1794_v0  ;;  %v743_v21 = vsub.f32 %v741_v30, %v742_v35 }
 0x14e   : > { %v744_v38 = vand.u32 4294901760, %v743_v21 }
 0x14f   : > { %1590 = vmatpush3.bf16.msra.mxu1 %v1970_v51 }
 0x150   : > { %1434 = vmatmul.mubr.f32.vlgmr.msra.gmra.mrb[2].mxu0 %v744_v38  ;;  %1591 = vmatprep.subr.bf16.mxu1 %v1794_v0 }
 0x151   : > { %1563 = vmatpush3.bf16.msra.mxu0 %v1562_v22  ;;  %1452 = vmatprep.mubr.msk.f32.mxu0 %vm1795_vm0, %v1796_v1 }
 0x152   : > { %1564 = vmatprep.subr.bf16.mxu0 %v1794_v0 }
 0x153   : > { %1593 = vmatpush3.bf16.msra.mxu1 %v1975_v55 }
 0x154   : > { %1594 = vmatprep.subr.bf16.mxu1 %v1794_v0 }
 0x155   : > { %1566 = vmatpush3.bf16.msra.mxu0 %v1565_v23 }
 0x156   : > { %1567 = vmatprep.subr.bf16.mxu0 %v1794_v0 }
 0x157   : > { %1596 = vmatpush3.bf16.msra.mxu1 %v1980_v56 }
 0x158   : > { %1597 = vmatprep.subr.bf16.mxu1 %v1794_v0 }
 0x159   : > { %1569 = vmatpush3.bf16.msra.mxu0 %v1568_v3 }
 0x15a   : > { %1491 = vmatmul.mubr.f32.vlgmr.msra.gmra.mrb[0].mxu1 %v742_v35  ;;  %1570 = vmatprep.subr.bf16.mxu0 %v1794_v0 }
 0x15b   : > { %1599 = vmatpush3.bf16.msra.mxu1 %v1598_v26  ;;  %1509 = vmatprep.mubr.msk.f32.mxu1 %vm1795_vm0, %v1796_v1 }
 0x15c   : > { %1600 = vmatprep.subr.bf16.mxu1 %v1794_v0 }
 0x15d   : > { %1572 = vmatpush3.bf16.msra.mxu0 %v1571_v8 }
 0x15f   : > { %1602 = vmatpush3.bf16.msra.mxu1 %v1601_v40 }
 0x160   : > { %1453 = vmatmul.mubr.f32.vlgmr.msra.gmra.mrb[2].mxu0 %v740_v29  ;;  %1603 = vmatprep.subr.bf16.mxu1 %v1794_v0 }
 0x163   : > { %1605 = vmatpush3.bf16.msra.mxu1 %v1604_v9 }
 0x164   : > { %1606 = vmatprep.subr.bf16.mxu1 %v1794_v0 }
 0x167   : > { %1608 = vmatpush3.bf16.msra.mxu1 %v1607_v10 }
 0x168   : > { %1609 = vmatprep.subr.bf16.mxu1 %v1794_v0 }
 0x16a   : > { %1510 = vmatmul.mubr.f32.vlgmr.msra.gmra.mrb[0].mxu1 %v740_v29 }
 0x16b   : > { %1611 = vmatpush3.bf16.msra.mxu1 %v1960_v39  ;;  %1528 = vmatprep.mubr.msk.f32.mxu1 %vm1795_vm0, %v1796_v1 }
 0x16c   : > { %1612 = vmatprep.subr.bf16.mxu1 %v1794_v0 }
 0x16f   : > { %1614 = vmatpush3.bf16.msra.mxu1 %v1970_v51 }
 0x170   : > { %1615 = vmatprep.subr.bf16.mxu1 %v1794_v0 }
 0x173   : > { %1617 = vmatpush3.bf16.msra.mxu1 %v1975_v55 }
 0x174   : > { %1618 = vmatprep.subr.bf16.mxu1 %v1794_v0 }
 0x177   : > { %1620 = vmatpush3.bf16.msra.mxu1 %v1980_v56 }
 0x17a   : > { %1529 = vmatmul.mubr.f32.vlgmr.msra.gmra.mrb[0].mxu1 %v740_v29 }
 0x233   : > { %v857_v41 = vpop.f32.mrb[2].mxu0 }
 0x234   : > { %v1454_v42 = vpop.f32.mrb[3].mxu0 }
 0x24d   : > { %v1200_v1 = vpop.f32.mrb[0].mxu1 }
 0x24e   : > { %v1621_v39 = vadd.f32 %v1200_v1, %v857_v41  ;;  %v1530_v43 = vpop.f32.mrb[1].mxu1 }
 0x250   : > { %1204 = vst [vmem:[%s176_s7] sm:$0xff] %v1621_v39 }
 0x251   : > { %1736 = shalt.err (!%p1733_p7)
}
 0x252   : > { %s1737_s25 = scalar_lea.hbm %s2028_s11, 128  ;;  %s1741_s28 = scalar_lea.hbm %s2073_s3, 384 }
 0x253   : > { %p1738_p8 = scmp.ne.s32.totalorder %s2028_s11, %s1737_s25  ;;  %p1742_p1 = scmp.lt.u32.totalorder %s2028_s11, %s2073_s3 }
 0x254   : > { %p1743_p0 = scmp.lt.u32.totalorder %s1741_s28, %s1737_s25  ;;  %p1745_p6 = scmp.lt.u32.totalorder %s1737_s25, %s2028_s11 }
 0x255   : > { %p1739_p11 = pnand %p1738_p8, %p2084_p9 }
 0x256   : > { %p1744_p5 = por %p1743_p0, %p1742_p1 }
 0x257   : > { %p1740_p13 = pneg %p1739_p11 }
 0x258   : > { %p1746_p10 = por %p1745_p6, %p1744_p5 }
 0x25a   : > { %p1747_p12 = pnand %p1746_p10, %p1740_p13 }
 0x25c   : > { %1750 = shalt.err (!%p1747_p12)
}
 0x25d   : > { %1644 = dma.vmem_to_hbm [thread:$0]  (%p2084_p9), %s2030_s8, 128, %s2028_s11, %s1206_s17  }
 0x25e PF: > { %p1656_p2 = scmp.ge.s32.totalorder %s1789_s15, 2  ;;  %s1231_s4 = sand.u32 1, %s1777_s12  }
 0x25f   : > { %p2085_p3 = scmp.ne.s32.totalorder %s2078_s23, 0  ;;  %s1232_s5 = scalar_lea.sflag [#allocation4], %s1231_s4 }
 0x261   : > { %p1651_p4 = pnand %p1656_p2, %p2085_p3 }
 0x263   : > { %1772 = dma.done.wait (!%p1651_p4), %s1232_s5, 128  }
 0x264   : > { %1774 = vsyncadd (!%p1651_p4), %s1232_s5, 4294967168  ;;  %p14_p7 = scmp.ge.s32.totalorder %s1843_s18, 5   ;;  %s2086_s12 = smov %s1781_s13 }
 0x265   : > { %s2087_s13 = smov %s1785_s14  ;;  %s2088_s14 = smov %s1854_s21 }
 0x266   : > { %s2089_s15 = smov %s1843_s18  ;;  %16 = sbr.rel (!%p14_p7) target bundleno = 4 (0x4), region = 72 }
 0x26d   :  { %1237 = vsyncpa [#allocation3], 1 }
 0x26e   :  { %1239 = vsyncpa [#allocation3 + $0x1], 1 }
 0x26f   :  { %1240 = vsyncpa [#allocation4], 1 }
 0x270   :  { %1242 = vsyncpa [#allocation4 + $0x1], 1 }

</bundles_post_ra>
